<compile_context>
chip_gen: v6e
topology: v6e:2x2x1
jax: 0.10.0
libtpu: 0.0.40
codegen_flags: <defaults>
</compile_context>

<pallas_src>
import functools

import jax
import jax.numpy as jnp
from jax.experimental import pallas as pl
from jax.experimental.pallas import tpu as pltpu


def _baselinepp_kernel(x_ref, w_ref, o_ref, invn_ref, *, batch_outer: bool):
    x = x_ref[...]                          # (tb, D) f32
    w = w_ref[...]                          # (tc, D) f32

    inner_first = pl.program_id(1) == 0

    if batch_outer:
        # x tile is resident across the inner (classes) sweep: cache 1/||x||.
        @pl.when(inner_first)
        def _():
            xs = jnp.sum(x * x, axis=-1, keepdims=True)      # (tb,1) f32 reduce
            invn_ref[...] = jax.lax.rsqrt(xs)                 # EUP
        inv_x = invn_ref[...]                                 # (tb, 1)
        ws = jnp.sum(w * w, axis=-1, keepdims=True)           # (tc, 1)
        inv_w = jax.lax.rsqrt(ws)
    else:
        # w tile is resident across the inner (batch) sweep: cache 1/||w||.
        @pl.when(inner_first)
        def _():
            ws = jnp.sum(w * w, axis=-1, keepdims=True)
            invn_ref[...] = jax.lax.rsqrt(ws)
        inv_w = invn_ref[...]                                 # (tc, 1)
        xs = jnp.sum(x * x, axis=-1, keepdims=True)
        inv_x = jax.lax.rsqrt(xs)

    # Pre-scale the weight tile by 1/||w|| (per-sublane scalar broadcast; no
    # transpose and no extra MXU pass).  The row scale 1/||x|| is applied to
    # the (tb, tc) result after the matmul (lane broadcast of a (tb,1) column).
    w_n = w * inv_w                                           # (tc, D)

    # Single MXU contraction over the shared D axis (weight-transposed path,
    # no w.T materialized).  HIGHEST precision keeps f32 accuracy.
    s = jax.lax.dot_general(
        x, w_n,
        dimension_numbers=(((1,), (1,)), ((), ())),
        preferred_element_type=jnp.float32,
        precision=jax.lax.Precision.HIGHEST,
    )                                                         # (tb, tc)

    o_ref[...] = s * inv_x


def _ceil_div(a: int, b: int) -> int:
    return -(-a // b)


def _round_up(a: int, b: int) -> int:
    return _ceil_div(a, b) * b


def baselinepp_forward(x: jax.Array, weight: jax.Array) -> jax.Array:
    """x: (B, D) float32, weight: (C, D) float32 -> (B, C) float32 cosine sims."""
    B, D = x.shape
    C, D2 = weight.shape
    assert D == D2

    # ---- Tile sizes -------------------------------------------------------
    # Whole array dims are legal block dims, so small B / C need no padding
    # (few-shot fast path: C=16 stays a 16-wide masked store, no 8x-padded
    # weight DMA).  Large dims use MXU/lane-friendly tiles with ragged
    # boundary blocks handled by Pallas.
    tb = B if B <= 256 else 256
    if C <= 256:
        tc = C
    else:
        # Split the class dim into >=2 tiles (<=512 wide, 128-aligned) so the
        # parallel outer axis can use both TensorCores on v7x.
        tc = min(512, _round_up(_ceil_div(C, 2), 128))

    nb = _ceil_div(B, tb)
    nc = _ceil_div(C, tc)

    # ---- Grid ordering ----------------------------------------------------
    # The operand indexed by the OUTER grid axis streams from HBM exactly
    # once; the inner-axis operand is re-streamed (outer extent) times.  Put
    # the larger of x / weight on the outer axis.
    batch_outer = B > C

    if batch_outer:
        grid = (nb, nc)
        x_spec = pl.BlockSpec((tb, D), lambda i, j: (i, 0))
        w_spec = pl.BlockSpec((tc, D), lambda i, j: (j, 0))
        o_spec = pl.BlockSpec((tb, tc), lambda i, j: (i, j))
        scratch = pltpu.VMEM((tb, 1), jnp.float32)            # cached 1/||x||
    else:
        grid = (nc, nb)
        x_spec = pl.BlockSpec((tb, D), lambda j, i: (i, 0))
        w_spec = pl.BlockSpec((tc, D), lambda j, i: (j, 0))
        o_spec = pl.BlockSpec((tb, tc), lambda j, i: (i, j))
        scratch = pltpu.VMEM((tc, 1), jnp.float32)            # cached 1/||w||

    kernel = functools.partial(_baselinepp_kernel, batch_outer=batch_outer)

    # VMEM at max tiles (tb=256, tc=512, D=1280, double-buffered) is ~13 MiB;
    # 32 MiB limit adds headroom on v5e and matches the v6e/v7x scoped default.
    return pl.pallas_call(
        kernel,
        out_shape=jax.ShapeDtypeStruct((B, C), jnp.float32),
        grid=grid,
        in_specs=[x_spec, w_spec],
        out_specs=o_spec,
        scratch_shapes=[scratch],
        compiler_params=pltpu.CompilerParams(
            # Outer axis: independent tiles -> megacore sharding.  Inner axis:
            # "arbitrary" guarantees in-order execution so the inv-norm cache
            # written at inner step 0 is valid for the rest of the sweep.
            dimension_semantics=("parallel", "arbitrary"),
            vmem_limit_bytes=32 * 1024 * 1024,
        ),
    )(x, weight)


def baselinepp_reference(x: jax.Array, weight: jax.Array) -> jax.Array:
    """Pure-JAX f32 reference mirroring the PyTorch forward."""
    xn = x / jnp.linalg.norm(x, axis=1, keepdims=True)
    wn = weight / jnp.linalg.norm(weight, axis=1, keepdims=True)
    return jnp.matmul(xn, wn.T, precision=jax.lax.Precision.HIGHEST)


if __name__ == "__main__":
    key = jax.random.PRNGKey(0)
    k_x, k_w = jax.random.split(key)

    B = 8             # small batch
    D = 1280          # feature dim fixed by the module (nn.Linear(1280, C))
    NUM_CLASSES = 16  # few-shot head

    x = jax.random.normal(k_x, (B, D), dtype=jnp.float32)
    # Deterministic synthetic init of the prototype layer weight (C, D).
    weight = jax.random.normal(k_w, (NUM_CLASSES, D), dtype=jnp.float32) * 0.02

    out = baselinepp_forward(x, weight)
    out = jax.block_until_ready(out)

    ref = baselinepp_reference(x, weight)
    assert out.shape == (B, NUM_CLASSES)
    assert jnp.allclose(out, ref, atol=1e-5, rtol=1e-5), "mismatch vs reference"

    print("KERNEL_OK")
</pallas_src>

<mosaic_0001>
module attributes {stable_mosaic.version = 11 : i64} {
  func.func @_baselinepp_kernel(%arg0: i32, %arg1: i32, %arg2: memref<8x1280xf32, #tpu.memory_space<vmem>>, %arg3: memref<16x1280xf32, #tpu.memory_space<vmem>>, %arg4: memref<8x16xf32, #tpu.memory_space<vmem>>, %arg5: memref<16x1xf32, #tpu.memory_space<vmem>>) attributes {dimension_semantics = [#tpu.dimension_semantics<parallel>, #tpu.dimension_semantics<arbitrary>], iteration_bounds = array<i64: 1, 1>, scalar_prefetch = 0 : i64, scratch_operands = 1 : i64, tpu.core_type = #tpu.core_type<tc>, window_params = [{transform_indices = @transform_0, window_bounds = array<i64: 8, 1280>}, {transform_indices = @transform_1, window_bounds = array<i64: 16, 1280>}, {transform_indices = @transform_2, window_bounds = array<i64: 8, 16>}]} {
    %c0 = arith.constant 0 : index
    %c0_0 = arith.constant 0 : index
    %0 = vector.load %arg2[%c0, %c0_0] : memref<8x1280xf32, #tpu.memory_space<vmem>>, vector<8x1280xf32>
    %c0_1 = arith.constant 0 : index
    %c0_2 = arith.constant 0 : index
    %1 = vector.load %arg3[%c0_1, %c0_2] : memref<16x1280xf32, #tpu.memory_space<vmem>>, vector<16x1280xf32>
    %c0_i32 = arith.constant 0 : i32
    %2 = arith.cmpi eq, %arg1, %c0_i32 : i32
    %3 = arith.extui %2 : i1 to i32
    %c0_i32_3 = arith.constant 0 : i32
    %4 = arith.cmpi ne, %3, %c0_i32_3 : i32
    scf.if %4 {
      %16 = arith.mulf %1, %1 : vector<16x1280xf32>
      %cst_9 = arith.constant dense<0.000000e+00> : vector<16xf32>
      %17 = vector.multi_reduction <add>, %16, %cst_9 [1] : vector<16x1280xf32> to vector<16xf32>
      %18 = vector.shape_cast %17 : vector<16xf32> to vector<16x1xf32>
      %19 = math.rsqrt %18 : vector<16x1xf32>
      %c0_10 = arith.constant 0 : index
      %c0_11 = arith.constant 0 : index
      %20 = vector.load %arg5[%c0_10, %c0_11] : memref<16x1xf32, #tpu.memory_space<vmem>>, vector<16x1xf32>
      tpu.vector_store %arg5[%c0_10, %c0_11], %19 {strides = array<i32>} : memref<16x1xf32, #tpu.memory_space<vmem>>, vector<16x1xf32>,
    } else {
    }
    %c0_4 = arith.constant 0 : index
    %c0_5 = arith.constant 0 : index
    %5 = vector.load %arg5[%c0_4, %c0_5] : memref<16x1xf32, #tpu.memory_space<vmem>>, vector<16x1xf32>
    %6 = arith.mulf %0, %0 : vector<8x1280xf32>
    %cst = arith.constant dense<0.000000e+00> : vector<8xf32>
    %7 = vector.multi_reduction <add>, %6, %cst [1] : vector<8x1280xf32> to vector<8xf32>
    %8 = vector.shape_cast %7 : vector<8xf32> to vector<8x1xf32>
    %9 = math.rsqrt %8 : vector<8x1xf32>
    %10 = vector.broadcast %5 : vector<16x1xf32> to vector<16x1280xf32>
    %11 = arith.mulf %1, %10 : vector<16x1280xf32>
    %cst_6 = arith.constant dense<0.000000e+00> : vector<8x16xf32>
    %12 = tpu.matmul %0, %11, %cst_6 {dimension_numbers = #tpu.dot_dimension_numbers<[1], [1], [0], [0], [0, 0, 1, 0], [], []>, precision = #tpu.contract_precision<fp32>} : vector<8x1280xf32>, vector<16x1280xf32>, vector<8x16xf32> -> vector<8x16xf32>
    %13 = vector.broadcast %9 : vector<8x1xf32> to vector<8x16xf32>
    %14 = arith.mulf %12, %13 : vector<8x16xf32>
    %c0_7 = arith.constant 0 : index
    %c0_8 = arith.constant 0 : index
    %15 = vector.load %arg4[%c0_7, %c0_8] : memref<8x16xf32, #tpu.memory_space<vmem>>, vector<8x16xf32>
    tpu.vector_store %arg4[%c0_7, %c0_8], %14 {strides = array<i32>} : memref<8x16xf32, #tpu.memory_space<vmem>>, vector<8x16xf32>,
    return
  }
  func.func @transform_0(%arg0: i32, %arg1: i32) -> (i32, i32) {
    %c0_i32 = arith.constant 0 : i32
    %c0_i32_0 = arith.constant 0 : i32
    return %arg1, %c0_i32 : i32, i32
  }
  func.func @transform_1(%arg0: i32, %arg1: i32) -> (i32, i32) {
    %c0_i32 = arith.constant 0 : i32
    %c0_i32_0 = arith.constant 0 : i32
    return %arg0, %c0_i32 : i32, i32
  }
  func.func @transform_2(%arg0: i32, %arg1: i32) -> (i32, i32) {
    %c0_i32 = arith.constant 0 : i32
    return %arg1, %arg0 : i32, i32
  }
}

</mosaic_0001>

<bundles_post_ra>
// kernel: tpu_custom_call.1
= control target key start
LH: loop header
LB: loop body
LE: loop exit
PB: predicated region body
PF: predicated region fallthrough
CT: control target
= control target key end

     0   :  { %7 = vsyncpa [#allocation4], 0  ;;  %s3295_s0 = inlined_call_operand.hbm [shape: f32[8,1280], index: 0, kind: input, shape index: {}]   ;;  %s3296_s1 = inlined_call_operand.hbm [shape: f32[16,1280], index: 1, kind: input, shape index: {}]   ;;  %s3297_s2 = inlined_call_operand.hbm [shape: f32[8,16], index: 2, kind: output, shape index: {}]  }
   0x1   :  { %8 = vsyncpa [#allocation7], 0 }
   0x2   :  { %9 = vsyncpa [#allocation5], 0  ;;  %s2762_s9 = smov [#allocation3]   ;;  %s2763_s11 = smov [#allocation6]  }
   0x3   :  { %s16_s10 = sshll.u32 %s2762_s9, 4  ;;  %s25_s12 = sshll.u32 %s2763_s11, 4  ;;  %s17_s10 = int_to_ptr.vmem [resolvable:$true] %s16_s10  ;;  %s26_s12 = int_to_ptr.vmem [resolvable:$true] %s25_s12 }
   0x4   :  { %s2704_s13 = scalar_lea.vmem %s17_s10, 1280  ;;  %p2709_p1 = scmp.lt.s32.totalorder %s17_s10, %s17_s10 }
   0x5   :  { %p2705_p0 = scmp.ne.s32.totalorder %s17_s10, %s2704_s13  ;;  %p2710_p2 = scmp.lt.s32.totalorder %s2704_s13, %s2704_s13 }
   0x7   :  { %p2711_p3 = por %p2710_p2, %p2709_p1 }
   0x9   :  { %p2712_p4 = pnand %p2711_p3, %p2705_p0 }
   0xb   :  { %2715 = shalt.err (!%p2712_p4)
}
   0xc   :  { %19 = dma.hbm_to_vmem [thread:$0]  %s3295_s0, 1280, %s17_s10, [#allocation4]  }
   0xd   :  { %s2724_s16 = scalar_lea.vmem %s26_s12, 2560  ;;  %p2729_p6 = scmp.lt.s32.totalorder %s26_s12, %s26_s12 }
   0xe   :  { %p2725_p5 = scmp.ne.s32.totalorder %s26_s12, %s2724_s16  ;;  %p2730_p7 = scmp.lt.s32.totalorder %s2724_s16, %s2724_s16 }
  0x10   :  { %p2731_p8 = por %p2730_p7, %p2729_p6 }
  0x12   :  { %p2732_p9 = pnand %p2731_p8, %p2725_p5 }
  0x14   :  { %2735 = shalt.err (!%p2732_p9)
}
  0x15   :  { %s2764_s17 = smov 1280   ;;  %s2765_s18 = smov 80  }
  0x16   :  { %31 = dma.hbm_to_vmem [thread:$0]  %s3296_s1, 2560, %s26_s12, [#allocation7], %s2764_s17, %s2764_s17, %s2765_s18  }
  0x17   :  { %2756 = dma.done.wait [#allocation4], 1280  }
  0x18   :  { %2757 = vsyncadd [#allocation4], 4294966016 }
  0x19   :  { %2758 = dma.done.wait [#allocation7], 2560  }
  0x1a   :  { %2759 = vsyncadd [#allocation7], 4294964736  ;;  %v2789_v0 = vld [vmem:[#allocation6 + $0x50] sm:$0xff]  ;;  %v2791_v1 = vld [vmem:[#allocation6 + $0x58] sm:$0xff]  ;;  %v2766_v58 = vmov 0   ;;  %vm116_vm0 = vcmask 7168  }
  0x1b   :  { %v2793_v2 = vld [vmem:[#allocation6 + $0x60] sm:$0xff]  ;;  %v2795_v3 = vld [vmem:[#allocation6 + $0x68] sm:$0xff]  ;;  %v82_v4 = vmul.f32 %v2789_v0, %v2789_v0  ;;  %v83_v5 = vmul.f32 %v2791_v1, %v2791_v1  ;;  %v2803_v7 = vld [vmem:[#allocation6 + $0x70] sm:$0xff]  ;;  %2688 = vset.pattern.permute.xlu1 %v2766_v58  ;;  %2689 = vset.pattern.permute.xlu0 %v2766_v58  ;;  %s2767_s0 = smov [#allocation8]   ;;  %vm2664_vm1 = vcmask 130048  }
  0x1c   :  { %v84_v6 = vmul.f32 %v2793_v2, %v2793_v2  ;;  %v85_v8 = vmul.f32 %v2795_v3, %v2795_v3  ;;  %v2807_v10 = vld [vmem:[#allocation6] sm:$0xff]  ;;  %v2809_v11 = vld [vmem:[#allocation6 + $0x8] sm:$0xff]  ;;  %v2811_v12 = vld [vmem:[#allocation6 + $0x78] sm:$0xff]  ;;  %v86_v17 = vmul.f32 %v2803_v7, %v2803_v7  ;;  %s2672_s1 = sshll.u32 %s2767_s0, 4  ;;  %s2673_s1 = int_to_ptr.vmem [resolvable:$true] %s2672_s1 }
  0x1d   :  { %v103_v9 = vadd.f32 %v83_v5, %v82_v4  ;;  %v2813_v13 = vld [vmem:[#allocation6 + $0x10] sm:$0xff]  ;;  %v2815_v14 = vld [vmem:[#allocation6 + $0x18] sm:$0xff]  ;;  %v72_v15 = vmul.f32 %v2807_v10, %v2807_v10  ;;  %v73_v16 = vmul.f32 %v2809_v11, %v2809_v11  ;;  %v2823_v19 = vld [vmem:[#allocation6 + $0x20] sm:$0xff]  ;;  %v87_v24 = vmul.f32 %v2811_v12, %v2811_v12  ;;  %s2736_s21 = scalar_lea.vmem %s2673_s1, 128  ;;  %p2741_p11 = scmp.lt.s32.totalorder %s2673_s1, %s2673_s1 }
  0x1e   :  { %v74_v20 = vmul.f32 %v2813_v13, %v2813_v13  ;;  %v2827_v21 = vld [vmem:[#allocation6 + $0x80] sm:$0xff]  ;;  %v75_v22 = vmul.f32 %v2815_v14, %v2815_v14  ;;  %v2833_v26 = vld [vmem:[#allocation6 + $0x28] sm:$0xff]  ;;  %v76_v28 = vmul.f32 %v2823_v19, %v2823_v19  ;;  %v2841_v32 = vld [vmem:[#allocation6 + $0x30] sm:$0xff]  ;;  %p2737_p10 = scmp.ne.s32.totalorder %s2673_s1, %s2736_s21  ;;  %p2742_p12 = scmp.lt.s32.totalorder %s2736_s21, %s2736_s21 }
  0x1f   :  { %v104_v18 = vadd.f32 %v103_v9, %v84_v6  ;;  %v92_v23 = vadd.f32 %v73_v16, %v72_v15  ;;  %v2835_v27 = vld [vmem:[#allocation6 + $0x88] sm:$0xff]  ;;  %v88_v30 = vmul.f32 %v2827_v21, %v2827_v21  ;;  %v2843_v33 = vld [vmem:[#allocation6 + $0x90] sm:$0xff]  ;;  %v77_v34 = vmul.f32 %v2833_v26, %v2833_v26  ;;  %v2849_v38 = vld [vmem:[#allocation6 + $0x38] sm:$0xff] }
  0x20   :  { %v89_v36 = vmul.f32 %v2835_v27, %v2835_v27  ;;  %v2851_v39 = vld [vmem:[#allocation6 + $0x98] sm:$0xff]  ;;  %v78_v40 = vmul.f32 %v2841_v32, %v2841_v32  ;;  %v90_v42 = vmul.f32 %v2843_v33, %v2843_v33  ;;  %v2857_v44 = vld [vmem:[#allocation6 + $0x40] sm:$0xff]  ;;  %v79_v45 = vmul.f32 %v2849_v38, %v2849_v38  ;;  %v2863_v49 = vld [vmem:[#allocation6 + $0x48] sm:$0xff]  ;;  %p2743_p13 = por %p2742_p12, %p2741_p11 }
  0x21   :  { %v105_v25 = vadd.f32 %v104_v18, %v85_v8  ;;  %v93_v29 = vadd.f32 %v92_v23, %v74_v20  ;;  %v91_v47 = vmul.f32 %v2851_v39, %v2851_v39  ;;  %v80_v50 = vmul.f32 %v2857_v44, %v2857_v44  ;;  %v2869_v63 = vld [vmem:[#allocation3 + $0x8] sm:$0xff] }
  0x22   :  { %v81_v53 = vmul.f32 %v2863_v49, %v2863_v49  ;;  %v2872_v4 = vand.u32 4294901760, %v2869_v63  ;;  %p2744_p0 = pnand %p2743_p13, %p2737_p10 }
  0x23   :  { %v106_v31 = vadd.f32 %v105_v25, %v86_v17  ;;  %v94_v35 = vadd.f32 %v93_v29, %v75_v22  ;;  %v2883_v17 = vld [vmem:[#allocation3] sm:$0xff] }
  0x24   :  { %v2876_v6 = vsub.f32 %v2869_v63, %v2872_v4  ;;  %342 = vmatprep.mubr.f32.mxu1 %v2872_v4  ;;  %v2886_v18 = vand.u32 4294901760, %v2883_v17 }
  0x25   :  { %v107_v37 = vadd.f32 %v106_v31, %v87_v24  ;;  %v95_v41 = vadd.f32 %v94_v35, %v76_v28 }
  0x26   :  { %v243_v8 = vand.u32 4294901760, %v2876_v6  ;;  %v2890_v20 = vsub.f32 %v2883_v17, %v2886_v18 }
  0x27   :  { %v108_v43 = vadd.f32 %v107_v37, %v88_v30  ;;  %v96_v46 = vadd.f32 %v95_v41, %v77_v34 }
  0x28   :  { %v244_v15 = vsub.f32 %v2876_v6, %v243_v8  ;;  %v249_v23 = vand.u32 4294901760, %v2890_v20 }
  0x29   :  { %v109_v48 = vadd.f32 %v108_v43, %v89_v36  ;;  %v97_v51 = vadd.f32 %v96_v46, %v78_v40  ;;  %v2923_v46 = vld [vmem:[#allocation3 + $0x18] sm:$0xff] }
  0x2a   :  { %v245_v16 = vand.u32 4294901760, %v244_v15  ;;  %v250_v31 = vsub.f32 %v2890_v20, %v249_v23 }
  0x2b   :  { %v110_v52 = vadd.f32 %v109_v48, %v90_v42  ;;  %v98_v54 = vadd.f32 %v97_v51, %v79_v45 }
  0x2c   :  { %246 = vmatprep.mubr.f32.mxu0 %v245_v16  ;;  %v251_v42 = vand.u32 4294901760, %v250_v31 }
  0x2d   :  { %v111_v55 = vadd.f32 %v110_v52, %v91_v47  ;;  %v99_v56 = vadd.f32 %v98_v54, %v80_v50  ;;  %v2927_v52 = vand.u32 4294901760, %v2923_v46 }
  0x2f   :  { %112 = vadd.xlane.f32.xlu0 %v111_v55  ;;  %v100_v57 = vadd.f32 %v99_v56, %v81_v53  ;;  %v40_v56 = vld [vmem:[#allocation3 + $0x10] sm:$0xff] }
  0x33   :  { %101 = vadd.xlane.f32.xlu0 %v100_v57 }
  0xb8   :  { %v113_v59 = vpop.xlane.xlu0 %112 }
  0xb9   :  { %2690 = vrsqrt.f32 %v113_v59 }
  0xbc   :  { %v102_v60 = vpop.xlane.xlu0 %101 }
  0xbd   :  { %2692 = vrsqrt.f32 %v102_v60  ;;  %v2936_v60 = vsub.f32 %v2923_v46, %v2927_v52 }
  0xc6   :  { %v2691_v61 = vpop.eup %2690 }
  0xc7   :  { %118 = vst.msk [vmem:[#allocation2 + $0x8] sm:$0xff] %vm116_vm0, %v2691_v61  ;;  %v2938_v61 = vand.u32 4294901760, %v40_v56 }
  0xc9   :  { %v2951_v15 = vsub.f32 %v40_v56, %v2938_v61 }
  0xca   :  { %v2693_v62 = vpop.eup %2692 }
  0xcb   :  { %117 = vst.msk [vmem:[#allocation2] sm:$0xff] %vm116_vm0, %v2693_v62 }
  0xce   :  { %v120_v5 = vld [vmem:[#allocation2 + $0x8] sm:$0xff] }
  0xcf   :  { %150 = vperm.xlu1 %2688, %v120_v5  }
  0xd2   :  { %v119_v9 = vld [vmem:[#allocation2] sm:$0xff] }
  0xd3   :  { %145 = vperm.xlu1 %2688, %v119_v9   ;;  %v741_v9 = vand.u32 4294901760, %v2936_v60 }
 0x14a   :  { %v2892_v22 = vpop.permute.xlu1 %150 }
 0x14b   :  { %v164_v24 = vmul.f32 %v2892_v22, %v2791_v1  ;;  %v163_v25 = vmul.f32 %v2892_v22, %v2789_v0  ;;  %v166_v55 = vmul.f32 %v2892_v22, %v2795_v3  ;;  %v165_v59 = vmul.f32 %v2892_v22, %v2793_v2 }
 0x14d   :  { %v2899_v28 = vand.u32 4294901760, %v164_v24  ;;  %v2901_v29 = vand.u32 4294901760, %v163_v25  ;;  %v2940_v62 = vand.u32 4294901760, %v166_v55  ;;  %v2945_v5 = vand.u32 4294901760, %v165_v59 }
 0x14e   :  { %v2903_v30 = vpop.permute.xlu1 %145 }
 0x14f   :  { %202 = vmatprep.subr.mxu0 %v2899_v28  ;;  %v154_v34 = vmul.f32 %v2903_v30, %v2809_v11  ;;  %v153_v1 = vmul.f32 %v2903_v30, %v2807_v10  ;;  %v286_v0 = vsub.f32 %v164_v24, %v2899_v28  ;;  %v292_v35 = vsub.f32 %v163_v25, %v2901_v29 }
 0x150   :  { %204 = vmatpush1.xpose.msra.mxu0 %v2901_v29  ;;  %v156_v3 = vmul.f32 %v2903_v30, %v2815_v14  ;;  %v155_v2 = vmul.f32 %v2903_v30, %v2813_v13  ;;  %v2958_v16 = vsub.f32 %v166_v55, %v2940_v62  ;;  %v122_v13 = vmul.f32 %v2869_v63, %v2869_v63 }
 0x151   :  { %v2916_v36 = vand.u32 4294901760, %v154_v34  ;;  %v2918_v37 = vand.u32 4294901760, %v153_v1  ;;  %v287_v40 = vand.u32 4294901760, %v286_v0  ;;  %v293_v41 = vand.u32 4294901760, %v292_v35 }
 0x152   :  { %v2955_v14 = vand.u32 4294901760, %v156_v3  ;;  %v121_v24 = vmul.f32 %v2883_v17, %v2883_v17  ;;  %v2970_v25 = vsub.f32 %v165_v59, %v2945_v5  ;;  %v2972_v31 = vand.u32 4294901760, %v155_v2 }
 0x153   :  { %206 = vmatprep.subr.mxu0 %v2916_v36  ;;  %v288_v43 = vsub.f32 %v286_v0, %v287_v40  ;;  %v294_v11 = vsub.f32 %v292_v35, %v293_v41  ;;  %v298_v45 = vsub.f32 %v154_v34, %v2916_v36  ;;  %v304_v10 = vsub.f32 %v153_v1, %v2918_v37 }
 0x154   :  { %208 = vmatpush1.xpose.msra.mxu0 %v2918_v37  ;;  %v742_v63 = vsub.f32 %v2936_v60, %v741_v9  ;;  %v747_v34 = vand.u32 4294901760, %v2951_v15  ;;  %v785_v17 = vand.u32 4294901760, %v2958_v16  ;;  %v2980_v1 = vsub.f32 %v156_v3, %v2955_v14 }
 0x155   :  { %379 = vmatprep.subr.mxu0 %v286_v0  ;;  %v289_v47 = vand.u32 4294901760, %v288_v43  ;;  %v295_v48 = vand.u32 4294901760, %v294_v11  ;;  %v299_v50 = vand.u32 4294901760, %v298_v45  ;;  %v305_v51 = vand.u32 4294901760, %v304_v10  ;;  %v42_v11 = vld [vmem:[#allocation3 + $0x20] sm:$0xff] }
 0x156   :  { %v2986_v0 = vsub.f32 %v155_v2, %v2972_v31  ;;  %v797_v43 = vand.u32 4294901760, %v2980_v1  ;;  %v3033_v2 = vld [vmem:[#allocation3 + $0x40] sm:$0xff] }
 0x157   :  { %290 = vmatprep.subr.mxu1 %v289_v47  ;;  %252 = vmatmul.mubr.f32.vlgmr.msra.gmra.mxu0 %v251_v42  ;;  %v300_v53 = vsub.f32 %v298_v45, %v299_v50  ;;  %v306_v54 = vsub.f32 %v304_v10, %v305_v51  ;;  %v124_v42 = vmul.f32 %v2923_v46, %v2923_v46 }
 0x158   :  { %296 = vmatpush1.xpose.msra.mxu1 %v295_v48  ;;  %382 = vmatpush1.xpose.msra.mxu0 %v292_v35  ;;  %v743_v35 = vand.u32 4294901760, %v742_v63  ;;  %v803_v46 = vand.u32 4294901760, %v2986_v0 }
 0x159   :  { %385 = vmatprep.subr.mxu0 %v298_v45  ;;  %v301_v57 = vand.u32 4294901760, %v300_v53  ;;  %v307_v58 = vand.u32 4294901760, %v306_v54  ;;  %423 = vmatprep.mubr.f32.mxu0 %v2876_v6  ;;  %v131_v6 = vadd.f32 %v122_v13, %v121_v24 }
 0x15a   :  { %v804_v55 = vsub.f32 %v2986_v0, %v803_v46 }
 0x15b   :  { %302 = vmatprep.subr.mxu1 %v301_v57  ;;  %v3025_v57 = vld [vmem:[#allocation3 + $0x38] sm:$0xff] }
 0x15c   :  { %308 = vmatpush1.xpose.msra.mxu1 %v307_v58  ;;  %388 = vmatpush1.xpose.msra.mxu0 %v304_v10  ;;  %v168_v58 = vmul.f32 %v2892_v22, %v2811_v12  ;;  %v128_v59 = vmul.f32 %v3025_v57, %v3025_v57  ;;  %v805_v24 = vand.u32 4294901760, %v804_v55  ;;  %v167_v12 = vmul.f32 %v2892_v22, %v2803_v7 }
 0x15d   :  { %460 = vmatprep.subr.mxu1 %v2899_v28  ;;  %542 = vmatprep.subr.mxu0 %v287_v40  ;;  %v748_v40 = vsub.f32 %v2951_v15, %v747_v34 }
 0x15f   :  { %344 = vmatmul.mubr.f32.vlgmr.msra.gmra.mxu1 %v2886_v18  ;;  %426 = vmatmul.mubr.f32.vlgmr.msra.gmra.mxu0 %v2890_v20  ;;  %v125_v20 = vmul.f32 %v42_v11, %v42_v11  ;;  %v749_v45 = vand.u32 4294901760, %v748_v40  ;;  %v158_v40 = vmul.f32 %v2903_v30, %v2833_v26 }
 0x160   :  { %462 = vmatpush1.xpose.msra.mxu1 %v2901_v29  ;;  %546 = vmatpush1.xpose.msra.mxu0 %v293_v41  ;;  %v791_v41 = vand.u32 4294901760, %v2970_v25 }
 0x161   :  { %464 = vmatprep.subr.mxu1 %v2916_v36  ;;  %550 = vmatprep.subr.mxu0 %v299_v50 }
 0x162   :  { %502 = vmatprep.mubr.f32.mxu1 %v243_v8  ;;  %588 = vmatprep.mubr.f32.mxu0 %v2872_v4  ;;  %v123_v8 = vmul.f32 %v40_v56, %v40_v56  ;;  %v792_v10 = vsub.f32 %v2970_v25, %v791_v41 }
 0x164   :  { %466 = vmatpush1.xpose.msra.mxu1 %v2918_v37  ;;  %554 = vmatpush1.xpose.msra.mxu0 %v305_v51  ;;  %v793_v54 = vand.u32 4294901760, %v792_v10 }
 0x165   :  { %624 = vmatprep.subr.mxu1 %v2899_v28  ;;  %700 = vmatprep.subr.mxu0 %v2940_v62  ;;  %v786_v28 = vsub.f32 %v2958_v16, %v785_v17 }
 0x167   :  { %506 = vmatmul.mubr.f32.vlgmr.msra.gmra.mxu1 %v249_v23  ;;  %590 = vmatmul.mubr.f32.vlgmr.msra.gmra.mxu0 %v2886_v18  ;;  %v132_v23 = vadd.f32 %v131_v6, %v123_v8  ;;  %v787_v47 = vand.u32 4294901760, %v786_v28  ;;  %v3045_v6 = vand.u32 4294901760, %v42_v11  ;;  %v3047_v8 = vld [vmem:[#allocation3 + $0x48] sm:$0xff] }
 0x168   :  { %626 = vmatpush1.xpose.msra.mxu1 %v2901_v29  ;;  %702 = vmatpush1.xpose.msra.mxu0 %v2945_v5  ;;  %v43_v29 = vld [vmem:[#allocation3 + $0x28] sm:$0xff]  ;;  %v130_v28 = vmul.f32 %v3047_v8, %v3047_v8 }
 0x169   :  { %628 = vmatprep.subr.mxu1 %v2916_v36  ;;  %704 = vmatprep.subr.mxu0 %v2955_v14  ;;  %v798_v36 = vsub.f32 %v2980_v1, %v797_v43  ;;  %v126_v48 = vmul.f32 %v43_v29, %v43_v29  ;;  %v133_v50 = vadd.f32 %v132_v23, %v124_v42  ;;  %v3023_v56 = vand.u32 4294901760, %v43_v29 }
 0x16a   :  { %664 = vmatprep.mubr.f32.mxu1 %v2872_v4  ;;  %744 = vmatprep.mubr.f32.mxu0 %v743_v35  ;;  %v3015_v4 = vld [vmem:[#allocation3 + $0x30] sm:$0xff]  ;;  %v3049_v35 = vand.u32 4294901760, %v168_v58  ;;  %v157_v23 = vmul.f32 %v2903_v30, %v2823_v19 }
 0x16b   :  { %v127_v51 = vmul.f32 %v3015_v4, %v3015_v4  ;;  %v134_v53 = vadd.f32 %v133_v50, %v125_v20  ;;  %v3043_v63 = vsub.f32 %v43_v29, %v3023_v56  ;;  %v3059_v20 = vand.u32 4294901760, %v167_v12 }
 0x16c   :  { %630 = vmatpush1.xpose.msra.mxu1 %v2918_v37  ;;  %706 = vmatpush1.xpose.msra.mxu0 %v2972_v31  ;;  %v799_v37 = vand.u32 4294901760, %v798_v36  ;;  %v3069_v10 = vsub.f32 %v168_v58, %v3049_v35  ;;  %v3146_v55 = vand.u32 4294901760, %v3015_v4 }
 0x16d   :  { %788 = vmatprep.subr.mxu1 %v787_v47  ;;  %877 = vmatprep.subr.mxu0 %v2958_v16  ;;  %v135_v3 = vadd.f32 %v134_v53, %v126_v48  ;;  %v1239_v26 = vand.u32 4294901760, %v3043_v63  ;;  %v3072_v16 = vsub.f32 %v42_v11, %v3045_v6  ;;  %v3084_v19 = vsub.f32 %v167_v12, %v3059_v20 }
 0x16e   :  { %v3086_v11 = vand.u32 4294901760, %v157_v23  ;;  %v169_v53 = vmul.f32 %v2892_v22, %v2827_v21  ;;  %v159_v21 = vmul.f32 %v2903_v30, %v2841_v32 }
 0x16f   :  { %666 = vmatmul.mubr.f32.vlgmr.msra.gmra.mxu1 %v2886_v18  ;;  %750 = vmatmul.mubr.f32.vlgmr.msra.gmra.mxu0 %v749_v45  ;;  %v129_v18 = vmul.f32 %v3033_v2, %v3033_v2  ;;  %v136_v13 = vadd.f32 %v135_v3, %v127_v51  ;;  %v3066_v45 = vand.u32 4294901760, %v158_v40  ;;  %v1245_v29 = vand.u32 4294901760, %v3072_v16 }
 0x170   :  { %794 = vmatpush1.xpose.msra.mxu1 %v793_v54  ;;  %880 = vmatpush1.xpose.msra.mxu0 %v2970_v25  ;;  %v1240_v25 = vsub.f32 %v3043_v63, %v1239_v26  ;;  %v170_v51 = vmul.f32 %v2892_v22, %v2835_v27  ;;  %v160_v27 = vmul.f32 %v2903_v30, %v2849_v38  ;;  %v3174_v3 = vand.u32 4294901760, %v159_v21 }
 0x171   :  { %800 = vmatprep.subr.mxu1 %v799_v37  ;;  %883 = vmatprep.subr.mxu0 %v2980_v1  ;;  %v137_v42 = vadd.f32 %v136_v13, %v128_v59  ;;  %v3094_v1 = vsub.f32 %v158_v40, %v3066_v45  ;;  %v3150_v37 = vand.u32 4294901760, %v169_v53  ;;  %v3164_v59 = vsub.f32 %v3015_v4, %v3146_v55 }
 0x172   :  { %840 = vmatprep.mubr.f32.mxu1 %v2927_v52  ;;  %921 = vmatprep.mubr.f32.mxu0 %v2936_v60  ;;  %v3102_v60 = vsub.f32 %v157_v23, %v3086_v11  ;;  %v3141_v54 = vand.u32 4294901760, %v170_v51  ;;  %v3157_v38 = vand.u32 4294901760, %v160_v27  ;;  %v3186_v12 = vsub.f32 %v159_v21, %v3174_v3 }
 0x173   :  { %v138_v7 = vadd.f32 %v137_v42, %v129_v18  ;;  %v3172_v32 = vsub.f32 %v169_v53, %v3150_v37  ;;  %v1743_v13 = vand.u32 4294901760, %v3164_v59 }
 0x174   :  { %806 = vmatpush1.xpose.msra.mxu1 %v805_v24  ;;  %886 = vmatpush1.xpose.msra.mxu0 %v2986_v0  ;;  %v1246_v0 = vsub.f32 %v3072_v16, %v1245_v29  ;;  %v3160_v58 = vsub.f32 %v170_v51, %v3141_v54  ;;  %v1792_v24 = vsub.f32 %v160_v27, %v3157_v38  ;;  %v1799_v23 = vand.u32 4294901760, %v3186_v12 }
 0x175   :  { %958 = vmatprep.subr.mxu1 %v2940_v62  ;;  %1040 = vmatprep.subr.mxu0 %v785_v17  ;;  %v139_v17 = vadd.f32 %v138_v7, %v130_v28  ;;  %v1787_v40 = vand.u32 4294901760, %v3172_v32  ;;  %v1744_v42 = vsub.f32 %v3164_v59, %v1743_v13 }
 0x176   :  { %v1247_v36 = vand.u32 4294901760, %v1246_v0  ;;  %v1781_v18 = vand.u32 4294901760, %v3160_v58 }
 0x177   :  { %842 = vmatmul.mubr.f32.vlgmr.msra.gmra.mxu1 %v2938_v61  ;;  %924 = vmatmul.mubr.f32.vlgmr.msra.gmra.mxu0 %v2951_v15  ;;  %v1788_v7 = vsub.f32 %v3172_v32, %v1787_v40 }
 0x178   :  { %960 = vmatpush1.xpose.msra.mxu1 %v2945_v5  ;;  %1044 = vmatpush1.xpose.msra.mxu0 %v791_v41  ;;  %v1283_v41 = vand.u32 4294901760, %v3069_v10  ;;  %v1782_v28 = vsub.f32 %v3160_v58, %v1781_v18 }
 0x179   :  { %962 = vmatprep.subr.mxu1 %v2955_v14  ;;  %1048 = vmatprep.subr.mxu0 %v797_v43  ;;  %v1289_v43 = vand.u32 4294901760, %v3084_v19 }
 0x17a   :  { %1000 = vmatprep.mubr.f32.mxu1 %v741_v9  ;;  %1086 = vmatprep.mubr.f32.mxu0 %v2927_v52  ;;  %v1241_v9 = vand.u32 4294901760, %v1240_v25  ;;  %v1284_v47 = vsub.f32 %v3069_v10, %v1283_v41  ;;  %v171_v25 = vmul.f32 %v2892_v22, %v2843_v33  ;;  %v161_v33 = vmul.f32 %v2903_v30, %v2857_v44 }
 0x17b   :  { %140 = vadd.xlane.f32.xlu0 %v139_v17  ;;  %v1290_v15 = vsub.f32 %v3084_v19, %v1289_v43 }
 0x17c   :  { %964 = vmatpush1.xpose.msra.mxu1 %v2972_v31  ;;  %1052 = vmatpush1.xpose.msra.mxu0 %v803_v46  ;;  %v1285_v46 = vand.u32 4294901760, %v1284_v47 }
 0x17d   :  { %1122 = vmatprep.subr.mxu1 %v2940_v62  ;;  %1198 = vmatprep.subr.mxu0 %v3049_v35  ;;  %v1295_v62 = vand.u32 4294901760, %v3094_v1 }
 0x17f   :  { %1004 = vmatmul.mubr.f32.vlgmr.msra.gmra.mxu1 %v747_v34  ;;  %1088 = vmatmul.mubr.f32.vlgmr.msra.gmra.mxu0 %v2938_v61  ;;  %v1301_v34 = vand.u32 4294901760, %v3102_v60  ;;  %v1296_v48 = vsub.f32 %v3094_v1, %v1295_v62 }
 0x180   :  { %1124 = vmatpush1.xpose.msra.mxu1 %v2945_v5  ;;  %1200 = vmatpush1.xpose.msra.mxu0 %v3059_v20  ;;  %v1291_v5 = vand.u32 4294901760, %v1290_v15 }
 0x181   :  { %1126 = vmatprep.subr.mxu1 %v2955_v14  ;;  %1202 = vmatprep.subr.mxu0 %v3066_v45  ;;  %v1302_v14 = vsub.f32 %v3102_v60, %v1301_v34  ;;  %v1297_v50 = vand.u32 4294901760, %v1296_v48 }
 0x182   :  { %1162 = vmatprep.mubr.f32.mxu1 %v2927_v52  ;;  %1242 = vmatprep.mubr.f32.mxu0 %v1241_v9  ;;  %v3126_v52 = vand.u32 4294901760, %v3025_v57 }
 0x184   :  { %1128 = vmatpush1.xpose.msra.mxu1 %v2972_v31  ;;  %1204 = vmatpush1.xpose.msra.mxu0 %v3086_v11  ;;  %v1303_v31 = vand.u32 4294901760, %v1302_v14 }
 0x185   :  { %1286 = vmatprep.subr.mxu1 %v1285_v46  ;;  %1375 = vmatprep.subr.mxu0 %v3069_v10  ;;  %v1745_v10 = vand.u32 4294901760, %v1744_v42 }
 0x187   :  { %1164 = vmatmul.mubr.f32.vlgmr.msra.gmra.mxu1 %v2938_v61  ;;  %1248 = vmatmul.mubr.f32.vlgmr.msra.gmra.mxu0 %v1247_v36  ;;  %v3139_v61 = vsub.f32 %v3025_v57, %v3126_v52 }
 0x188   :  { %1292 = vmatpush1.xpose.msra.mxu1 %v1291_v5  ;;  %1378 = vmatpush1.xpose.msra.mxu0 %v3084_v19  ;;  %v172_v19 = vmul.f32 %v2892_v22, %v2851_v39  ;;  %v162_v39 = vmul.f32 %v2903_v30, %v2863_v49  ;;  %v3251_v30 = vand.u32 4294901760, %v161_v33 }
 0x189   :  { %1298 = vmatprep.subr.mxu1 %v1297_v50  ;;  %1381 = vmatprep.subr.mxu0 %v3094_v1  ;;  %v1737_v57 = vand.u32 4294901760, %v3139_v61  ;;  %v3231_v1 = vand.u32 4294901760, %v171_v25 }
 0x18a   :  { %1338 = vmatprep.mubr.f32.mxu1 %v3023_v56  ;;  %1419 = vmatprep.mubr.f32.mxu0 %v3043_v63  ;;  %v3238_v49 = vand.u32 4294901760, %v162_v39  ;;  %v2296_v0 = vsub.f32 %v161_v33, %v3251_v30 }
 0x18b   :  { %v1738_v4 = vsub.f32 %v3139_v61, %v1737_v57  ;;  %v2284_v44 = vsub.f32 %v171_v25, %v3231_v1 }
 0x18c   :  { %1304 = vmatpush1.xpose.msra.mxu1 %v1303_v31  ;;  %1384 = vmatpush1.xpose.msra.mxu0 %v3102_v60  ;;  %v2290_v47 = vsub.f32 %v162_v39, %v3238_v49  ;;  %v2297_v5 = vand.u32 4294901760, %v2296_v0 }
 0x18d   :  { %1456 = vmatprep.subr.mxu1 %v3049_v35  ;;  %1538 = vmatprep.subr.mxu0 %v1283_v41  ;;  %v1739_v63 = vand.u32 4294901760, %v1738_v4  ;;  %v3222_v41 = vand.u32 4294901760, %v172_v19  ;;  %v2285_v15 = vand.u32 4294901760, %v2284_v44 }
 0x18e   :  { %v2291_v36 = vand.u32 4294901760, %v2290_v47  ;;  %v2298_v53 = vsub.f32 %v2296_v0, %v2297_v5 }
 0x18f   :  { %1340 = vmatmul.mubr.f32.vlgmr.msra.gmra.mxu1 %v3045_v6  ;;  %1422 = vmatmul.mubr.f32.vlgmr.msra.gmra.mxu0 %v3072_v16  ;;  %v2286_v48 = vsub.f32 %v2284_v44, %v2285_v15 }
 0x190   :  { %1458 = vmatpush1.xpose.msra.mxu1 %v3059_v20  ;;  %1542 = vmatpush1.xpose.msra.mxu0 %v1289_v43  ;;  %v2292_v51 = vsub.f32 %v2290_v47, %v2291_v36 }
 0x191   :  { %1460 = vmatprep.subr.mxu1 %v3066_v45  ;;  %1546 = vmatprep.subr.mxu0 %v1295_v62  ;;  %v2287_v31 = vand.u32 4294901760, %v2286_v48 }
 0x192   :  { %1498 = vmatprep.mubr.f32.mxu1 %v1239_v26  ;;  %1584 = vmatprep.mubr.f32.mxu0 %v3023_v56  ;;  %v1783_v26 = vand.u32 4294901760, %v1782_v28 }
 0x194   :  { %1462 = vmatpush1.xpose.msra.mxu1 %v3086_v11  ;;  %1550 = vmatpush1.xpose.msra.mxu0 %v1301_v34 }
 0x195   :  { %1620 = vmatprep.subr.mxu1 %v3049_v35  ;;  %1696 = vmatprep.subr.mxu0 %v3141_v54  ;;  %v1793_v35 = vand.u32 4294901760, %v1792_v24 }
 0x197   :  { %1502 = vmatmul.mubr.f32.vlgmr.msra.gmra.mxu1 %v1245_v29  ;;  %1586 = vmatmul.mubr.f32.vlgmr.msra.gmra.mxu0 %v3045_v6  ;;  %v1794_v16 = vsub.f32 %v1792_v24, %v1793_v35  ;;  %v3227_v29 = vand.u32 4294901760, %v3033_v2 }
 0x198   :  { %1622 = vmatpush1.xpose.msra.mxu1 %v3059_v20  ;;  %1698 = vmatpush1.xpose.msra.mxu0 %v3150_v37  ;;  %v1789_v20 = vand.u32 4294901760, %v1788_v7 }
 0x199   :  { %1624 = vmatprep.subr.mxu1 %v3066_v45  ;;  %1700 = vmatprep.subr.mxu0 %v3157_v38  ;;  %v1800_v45 = vsub.f32 %v3186_v12, %v1799_v23  ;;  %v1795_v17 = vand.u32 4294901760, %v1794_v16  ;;  %v3243_v60 = vsub.f32 %v3033_v2, %v3227_v29 }
 0x19a   :  { %1660 = vmatprep.mubr.f32.mxu1 %v3023_v56  ;;  %1740 = vmatprep.mubr.f32.mxu0 %v1739_v63  ;;  %v3208_v56 = vand.u32 4294901760, %v3047_v8 }
 0x19b   :  { %v2241_v43 = vand.u32 4294901760, %v3243_v60 }
 0x19c   :  { %1626 = vmatpush1.xpose.msra.mxu1 %v3086_v11  ;;  %1702 = vmatpush1.xpose.msra.mxu0 %v3174_v3  ;;  %v1801_v11 = vand.u32 4294901760, %v1800_v45 }
 0x19d   :  { %1784 = vmatprep.subr.mxu1 %v1783_v26  ;;  %1873 = vmatprep.subr.mxu0 %v3160_v58  ;;  %v2242_v46 = vsub.f32 %v3243_v60, %v2241_v43 }
 0x19f   :  { %1662 = vmatmul.mubr.f32.vlgmr.msra.gmra.mxu1 %v3045_v6  ;;  %1746 = vmatmul.mubr.f32.vlgmr.msra.gmra.mxu0 %v1745_v10  ;;  %v3220_v6 = vsub.f32 %v3047_v8, %v3208_v56  ;;  %v2278_v8 = vsub.f32 %v172_v19, %v3222_v41  ;;  %v2243_v50 = vand.u32 4294901760, %v2242_v46 }
 0x1a0   :  { %1790 = vmatpush1.xpose.msra.mxu1 %v1789_v20  ;;  %1876 = vmatpush1.xpose.msra.mxu0 %v3172_v32 }
 0x1a1   :  { %1796 = vmatprep.subr.mxu1 %v1795_v17  ;;  %1879 = vmatprep.subr.mxu0 %v1792_v24  ;;  %v2235_v22 = vand.u32 4294901760, %v3220_v6  ;;  %v2279_v9 = vand.u32 4294901760, %v2278_v8 }
 0x1a2   :  { %1836 = vmatprep.mubr.f32.mxu1 %v3126_v52  ;;  %1917 = vmatprep.mubr.f32.mxu0 %v3139_v61  ;;  %v2293_v61 = vand.u32 4294901760, %v2292_v51 }
 0x1a3   :  { %v2236_v2 = vsub.f32 %v3220_v6, %v2235_v22  ;;  %v2280_v34 = vsub.f32 %v2278_v8, %v2279_v9 }
 0x1a4   :  { %1802 = vmatpush1.xpose.msra.mxu1 %v1801_v11  ;;  %1882 = vmatpush1.xpose.msra.mxu0 %v3186_v12 }
 0x1a5   :  { %1954 = vmatprep.subr.mxu1 %v3141_v54  ;;  %2036 = vmatprep.subr.mxu0 %v1781_v18  ;;  %v2237_v62 = vand.u32 4294901760, %v2236_v2  ;;  %v2281_v14 = vand.u32 4294901760, %v2280_v34 }
 0x1a7   :  { %1838 = vmatmul.mubr.f32.vlgmr.msra.gmra.mxu1 %v3146_v55  ;;  %1920 = vmatmul.mubr.f32.vlgmr.msra.gmra.mxu0 %v3164_v59 }
 0x1a8   :  { %1956 = vmatpush1.xpose.msra.mxu1 %v3150_v37  ;;  %2040 = vmatpush1.xpose.msra.mxu0 %v1787_v40 }
 0x1a9   :  { %1958 = vmatprep.subr.mxu1 %v3157_v38  ;;  %2044 = vmatprep.subr.mxu0 %v1793_v35 }
 0x1aa   :  { %1996 = vmatprep.mubr.f32.mxu1 %v1737_v57  ;;  %2082 = vmatprep.mubr.f32.mxu0 %v3126_v52 }
 0x1ac   :  { %1960 = vmatpush1.xpose.msra.mxu1 %v3174_v3  ;;  %2048 = vmatpush1.xpose.msra.mxu0 %v1799_v23 }
 0x1ad   :  { %2118 = vmatprep.subr.mxu1 %v3141_v54  ;;  %2194 = vmatprep.subr.mxu0 %v3222_v41 }
 0x1af   :  { %2000 = vmatmul.mubr.f32.vlgmr.msra.gmra.mxu1 %v1743_v13  ;;  %2084 = vmatmul.mubr.f32.vlgmr.msra.gmra.mxu0 %v3146_v55 }
 0x1b0   :  { %2120 = vmatpush1.xpose.msra.mxu1 %v3150_v37  ;;  %2196 = vmatpush1.xpose.msra.mxu0 %v3231_v1 }
 0x1b1   :  { %2122 = vmatprep.subr.mxu1 %v3157_v38  ;;  %2198 = vmatprep.subr.mxu0 %v3238_v49 }
 0x1b2   :  { %2158 = vmatprep.mubr.f32.mxu1 %v3126_v52  ;;  %2238 = vmatprep.mubr.f32.mxu0 %v2237_v62  ;;  %v2299_v52 = vand.u32 4294901760, %v2298_v53 }
 0x1b4   :  { %2124 = vmatpush1.xpose.msra.mxu1 %v3174_v3  ;;  %2200 = vmatpush1.xpose.msra.mxu0 %v3251_v30 }
 0x1b5   :  { %2282 = vmatprep.subr.mxu1 %v2281_v14  ;;  %2371 = vmatprep.subr.mxu0 %v2278_v8 }
 0x1b7   :  { %2160 = vmatmul.mubr.f32.vlgmr.msra.gmra.mxu1 %v3146_v55  ;;  %2244 = vmatmul.mubr.f32.vlgmr.msra.gmra.mxu0 %v2243_v50 }
 0x1b8   :  { %2288 = vmatpush1.xpose.msra.mxu1 %v2287_v31  ;;  %2374 = vmatpush1.xpose.msra.mxu0 %v2284_v44 }
 0x1b9   :  { %2294 = vmatprep.subr.mxu1 %v2293_v61  ;;  %2377 = vmatprep.subr.mxu0 %v2290_v47 }
 0x1ba   :  { %2334 = vmatprep.mubr.f32.mxu1 %v3208_v56  ;;  %2415 = vmatprep.mubr.f32.mxu0 %v3220_v6 }
 0x1bc   :  { %2300 = vmatpush1.xpose.msra.mxu1 %v2299_v52  ;;  %2380 = vmatpush1.xpose.msra.mxu0 %v2296_v0 }
 0x1bd   :  { %2452 = vmatprep.subr.mxu1 %v3222_v41  ;;  %2534 = vmatprep.subr.mxu0 %v2279_v9 }
 0x1bf   :  { %2336 = vmatmul.mubr.f32.vlgmr.msra.gmra.mxu1 %v3227_v29  ;;  %2418 = vmatmul.mubr.f32.vlgmr.msra.gmra.mxu0 %v3243_v60 }
 0x1c0   :  { %2454 = vmatpush1.xpose.msra.mxu1 %v3231_v1  ;;  %2538 = vmatpush1.xpose.msra.mxu0 %v2285_v15 }
 0x1c1   :  { %2456 = vmatprep.subr.mxu1 %v3238_v49  ;;  %2542 = vmatprep.subr.mxu0 %v2291_v36 }
 0x1c2   :  { %2494 = vmatprep.mubr.f32.mxu1 %v2235_v22  ;;  %2580 = vmatprep.mubr.f32.mxu0 %v3208_v56 }
 0x1c4   :  { %2458 = vmatpush1.xpose.msra.mxu1 %v3251_v30  ;;  %2546 = vmatpush1.xpose.msra.mxu0 %v2297_v5 }
 0x1c5   :  { %2616 = vmatprep.subr.mxu1 %v3222_v41 }
 0x1c7   :  { %2498 = vmatmul.mubr.f32.vlgmr.msra.gmra.mxu1 %v2241_v43  ;;  %2582 = vmatmul.mubr.f32.vlgmr.msra.gmra.mxu0 %v3227_v29 }
 0x1c8   :  { %2618 = vmatpush1.xpose.msra.mxu1 %v3231_v1  ;;  %2656 = vmatprep.mubr.f32.mxu1 %v3208_v56 }
 0x1c9   :  { %2620 = vmatprep.subr.mxu1 %v3238_v49 }
 0x1cc   :  { %2622 = vmatpush1.xpose.msra.mxu1 %v3251_v30 }
 0x1cf   :  { %2658 = vmatmul.mubr.f32.vlgmr.msra.gmra.mxu1 %v3227_v29 }
 0x217   :  { %v253_v54 = vpop.f32.mrf.mxu0 }
 0x219   :  { %v255_v27 = vpop.f32.mrf.mxu0 }
 0x21f   :  { %v345_v55 = vpop.f32.mrf.mxu1  ;;  %v427_v37 = vpop.f32.mrf.mxu0 }
 0x220   :  { %v346_v28 = vadd.f32 %v345_v55, %v253_v54 }
 0x221   :  { %v347_v21 = vpop.f32.mrf.mxu1  ;;  %v429_v57 = vpop.f32.mrf.mxu0 }
 0x222   :  { %v428_v7 = vadd.f32 %v427_v37, %v346_v28 }
 0x227   :  { %v507_v38 = vpop.f32.mrf.mxu1  ;;  %v591_v58 = vpop.f32.mrf.mxu0 }
 0x228   :  { %v508_v10 = vadd.f32 %v507_v38, %v428_v7 }
 0x229   :  { %v509_v59 = vpop.f32.mrf.mxu1  ;;  %v593_v32 = vpop.f32.mrf.mxu0 }
 0x22a   :  { %v592_v16 = vadd.f32 %v591_v58, %v508_v10  ;;  %v141_v32 = vpop.xlane.xlu0 %140 }
 0x22b   :  { %2694 = vrsqrt.f32 %v141_v32 }
 0x22f   :  { %v667_v3 = vpop.f32.mrf.mxu1  ;;  %v751_v4 = vpop.f32.mrf.mxu0 }
 0x230   :  { %v668_v56 = vadd.f32 %v667_v3, %v592_v16 }
 0x231   :  { %v669_v18 = vpop.f32.mrf.mxu1  ;;  %v753_v13 = vpop.f32.mrf.mxu0 }
 0x232   :  { %v752_v11 = vadd.f32 %v751_v4, %v668_v56 }
 0x237   :  { %v843_v24 = vpop.f32.mrf.mxu1  ;;  %v925_v12 = vpop.f32.mrf.mxu0 }
 0x238   :  { %v844_v25 = vadd.f32 %v843_v24, %v752_v11 }
 0x239   :  { %v845_v63 = vpop.f32.mrf.mxu1  ;;  %v927_v40 = vpop.f32.mrf.mxu0 }
 0x23a   :  { %v926_v1 = vadd.f32 %v925_v12, %v844_v25 }
 0x23f   :  { %v1005_v42 = vpop.f32.mrf.mxu1  ;;  %v1089_v35 = vpop.f32.mrf.mxu0 }
 0x240   :  { %v1006_v33 = vadd.f32 %v1005_v42, %v926_v1 }
 0x241   :  { %v1007_v23 = vpop.f32.mrf.mxu1  ;;  %v1091_v26 = vpop.f32.mrf.mxu0 }
 0x242   :  { %v1090_v8 = vadd.f32 %v1089_v35, %v1006_v33  ;;  %v2695_v26 = vpop.eup %2694 }
 0x247   :  { %v1165_v20 = vpop.f32.mrf.mxu1  ;;  %v1249_v45 = vpop.f32.mrf.mxu0 }
 0x248   :  { %v1166_v30 = vadd.f32 %v1165_v20, %v1090_v8 }
 0x249   :  { %v1167_v17 = vpop.f32.mrf.mxu1  ;;  %v1251_v19 = vpop.f32.mrf.mxu0 }
 0x24a   :  { %v1250_v2 = vadd.f32 %v1249_v45, %v1166_v30 }
 0x24f   :  { %v1341_v6 = vpop.f32.mrf.mxu1  ;;  %v1423_v41 = vpop.f32.mrf.mxu0 }
 0x250   :  { %v1342_v47 = vadd.f32 %v1341_v6, %v1250_v2 }
 0x251   :  { %v1343_v39 = vpop.f32.mrf.mxu1  ;;  %v1425_v29 = vpop.f32.mrf.mxu0 }
 0x252   :  { %v1424_v15 = vadd.f32 %v1423_v41, %v1342_v47 }
 0x257   :  { %v1503_v22 = vpop.f32.mrf.mxu1  ;;  %v1587_v49 = vpop.f32.mrf.mxu0 }
 0x258   :  { %v1504_v34 = vadd.f32 %v1503_v22, %v1424_v15 }
 0x259   :  { %v1505_v60 = vpop.f32.mrf.mxu1  ;;  %v1589_v44 = vpop.f32.mrf.mxu0 }
 0x25a   :  { %v1588_v14 = vadd.f32 %v1587_v49, %v1504_v34 }
 0x25f   :  { %v1663_v9 = vpop.f32.mrf.mxu1  ;;  %v1747_v43 = vpop.f32.mrf.mxu0 }
 0x260   :  { %v1664_v50 = vadd.f32 %v1663_v9, %v1588_v14 }
 0x261   :  { %v1665_v0 = vpop.f32.mrf.mxu1  ;;  %v1749_v62 = vpop.f32.mrf.mxu0 }
 0x262   :  { %v1748_v53 = vadd.f32 %v1747_v43, %v1664_v50 }
 0x267   :  { %v1839_v46 = vpop.f32.mrf.mxu1  ;;  %v1921_v36 = vpop.f32.mrf.mxu0 }
 0x268   :  { %v1840_v54 = vadd.f32 %v1839_v46, %v1748_v53 }
 0x269   :  { %v1841_v48 = vpop.f32.mrf.mxu1  ;;  %v1923_v5 = vpop.f32.mrf.mxu0 }
 0x26a   :  { %v1922_v27 = vadd.f32 %v1921_v36, %v1840_v54 }
 0x26f   :  { %v2001_v51 = vpop.f32.mrf.mxu1  ;;  %v2085_v31 = vpop.f32.mrf.mxu0 }
 0x270   :  { %v2002_v21 = vadd.f32 %v2001_v51, %v1922_v27 }
 0x271   :  { %v2003_v61 = vpop.f32.mrf.mxu1  ;;  %v2087_v52 = vpop.f32.mrf.mxu0 }
 0x272   :  { %v2086_v58 = vadd.f32 %v2085_v31, %v2002_v21 }
 0x277   :  { %v2161_v55 = vpop.f32.mrf.mxu1  ;;  %v2245_v37 = vpop.f32.mrf.mxu0 }
 0x278   :  { %v2162_v59 = vadd.f32 %v2161_v55, %v2086_v58 }
 0x279   :  { %v2163_v57 = vpop.f32.mrf.mxu1  ;;  %v2247_v38 = vpop.f32.mrf.mxu0 }
 0x27a   :  { %v2246_v24 = vadd.f32 %v2245_v37, %v2162_v59 }
 0x27f   :  { %v2337_v3 = vpop.f32.mrf.mxu1  ;;  %v2419_v4 = vpop.f32.mrf.mxu0 }
 0x280   :  { %v2338_v12 = vadd.f32 %v2337_v3, %v2246_v24 }
 0x281   :  { %v2339_v18 = vpop.f32.mrf.mxu1  ;;  %v2421_v13 = vpop.f32.mrf.mxu0 }
 0x282   :  { %v2420_v28 = vadd.f32 %v2419_v4, %v2338_v12 }
 0x287   :  { %v2499_v63 = vpop.f32.mrf.mxu1  ;;  %v2583_v40 = vpop.f32.mrf.mxu0 }
 0x288   :  { %v2500_v7 = vadd.f32 %v2499_v63, %v2420_v28 }
 0x289   :  { %v2501_v42 = vpop.f32.mrf.mxu1  ;;  %v2585_v35 = vpop.f32.mrf.mxu0 }
 0x28a   :  { %v2584_v23 = vadd.f32 %v2583_v40, %v2500_v7 }
 0x28f   :  { %v2659_v10 = vpop.f32.mrf.mxu1 }
 0x290   :  { %v2660_v16 = vadd.f32 %v2659_v10, %v2584_v23 }
 0x291   :  { %v2661_v20 = vpop.f32.mrf.mxu1 }
 0x292   :  { %v2663_v45 = vmul.f32 %v2695_v26, %v2660_v16 }
 0x294   :  { %2665 = vst.msk [vmem:[#allocation8] sm:$0xff] %vm2664_vm1, %v2663_v45 }
 0x295   :  { %2747 = shalt.err (!%p2744_p0)
}
 0x296   :  { %2675 = dma.vmem_to_hbm [thread:$0]  %s2673_s1, 128, %s3297_s2, [#allocation5]  }
 0x297   :  { %2760 = dma.done.wait [#allocation5], 128  }
 0x298   :  { %2761 = vsyncadd [#allocation5], 4294967168 }
 0x299   :  { %2679 = vsyncpa [#allocation4], 1 }
 0x29a   :  { %2680 = vsyncpa [#allocation7], 1 }
 0x29b   :  { %2681 = vsyncpa [#allocation5], 1 }

</bundles_post_ra>
